<compile_context>
chip_gen: v7x
topology: tpu7x:2x2x1
jax: 0.10.0
libtpu: 0.0.40
codegen_flags: <defaults>
</compile_context>

<pallas_src>
import functools

import jax
import jax.numpy as jnp
from jax.experimental import pallas as pl
from jax.experimental.pallas import tpu as pltpu

BN_EPS = 1e-5
LANES = 128


def _round_up(x, m):
    return (x + m - 1) // m * m


def _fcn_kernel(n_ref, x_ref, w_ref, v_ref, o_ref, *, layer_dims, out_dim):
    """Fused MLP forward, feature-major activations.

    n_ref : (1,) i32 SMEM    true batch size (>= 1)
    x_ref : (Bp, D) f32      batch-major input; rows >= n_valid are zero
    w_ref : (L, C, C) f32    zero-padded weights, out = W @ in
    v_ref : (C, 3L) f32      col 3i = bias_i, 3i+1 = gamma_i, 3i+2 = beta_i
    o_ref : (out_dim, Bp) f32
    """
    bp = x_ref.shape[0]
    n_linear = len(layer_dims)

    n_i = n_ref[0]
    inv_n = 1.0 / jnp.full((1, 1), n_i, jnp.float32)          # exact 1/N (vector op)
    lane_ids = jax.lax.broadcasted_iota(jnp.int32, (1, bp), 1)
    mask = (lane_ids < n_i).astype(jnp.float32)

    h = None
    for i, (out_r, in_r) in enumerate(layer_dims):
        w = w_ref[i, :out_r, :in_r]                           # static sub-view, free
        if i == 0:
            # Contract feature dims of (out_r, D) x (Bp, D): MXU emits (out_r, Bp)
            # feature-major directly -- no wrapper-side transpose of x needed.
            h = jax.lax.dot_general(
                w, x_ref[...],
                dimension_numbers=(((1,), (1,)), ((), ())),
                preferred_element_type=jnp.float32)
        else:
            h = jnp.dot(w, h, preferred_element_type=jnp.float32)

        if i < n_linear - 1:
            # BatchNorm1d (training mode). Linear bias is skipped: the mean
            # subtraction cancels it exactly, and skipping it keeps padded batch
            # columns exactly zero so unmasked sum/sumsq are exact batch stats.
            g = v_ref[:out_r, 3 * i + 1:3 * i + 2]            # gamma (out_r, 1)
            be = v_ref[:out_r, 3 * i + 2:3 * i + 3]           # beta  (out_r, 1)
            s1 = jnp.sum(h, axis=1, keepdims=True)
            s2 = jnp.sum(h * h, axis=1, keepdims=True)
            mean = s1 * inv_n
            var = s2 * inv_n - mean * mean                    # biased variance
            scale = g * jax.lax.rsqrt(var + BN_EPS)           # rsqrt -> EUP slot
            shift = be - mean * scale
            h = jnp.maximum(h * scale + shift, 0.0)           # folded BN + ReLU
            if i < n_linear - 2:
                h = h * mask                                  # re-zero padded lanes
        else:
            b = v_ref[:out_r, 3 * i:3 * i + 1]                # final-layer bias
            h = h + b

    # Lane-dense (Bp multiple of 128), single-sublane-row store.
    o_ref[...] = h[:out_dim, :].astype(o_ref.dtype)


def fcn_forward(x, packed):
    """x: (B, input_dim) f32 -> (B, output_dim) f32 (PyTorch forward, train-mode BN)."""
    w_packed, v_packed, layer_dims, input_dim, output_dim = packed
    b, d = x.shape
    assert d == input_dim and b >= 1
    bp = _round_up(b, LANES)

    xp = x.astype(jnp.float32)
    if bp != b:
        xp = jnp.pad(xp, ((0, bp - b), (0, 0)))   # cheap contiguous row pad, no transpose
    n_valid = jnp.array([b], jnp.int32)

    n_linear, c_pad, _ = w_packed.shape
    resident = 4 * (bp * d + 4 * c_pad * bp + n_linear * c_pad * c_pad
                    + c_pad * 3 * n_linear + bp * output_dim)
    # Keep >= default 32 MiB, stay under v7x's 64 MiB physical VMEM.
    # TODO(synk): raise toward ~100 MiB on v5e/v6e (128 MiB physical) for large batches.
    vmem_limit = int(min(max(2 * resident, 32 << 20), 60 << 20))

    smem = pl.BlockSpec(memory_space=pltpu.MemorySpace.SMEM)
    vmem = pl.BlockSpec(memory_space=pltpu.MemorySpace.VMEM)
    kernel = functools.partial(_fcn_kernel, layer_dims=layer_dims, out_dim=output_dim)
    out = pl.pallas_call(
        kernel,
        out_shape=jax.ShapeDtypeStruct((output_dim, bp), jnp.float32),
        in_specs=[smem, vmem, vmem, vmem],
        out_specs=vmem,
        compiler_params=pltpu.CompilerParams(vmem_limit_bytes=vmem_limit),
    )(n_valid, xp, w_packed, v_packed)
    return out[:, :b].T


def init_params(key, input_dim, hidden_layers=(8, 16, 8), output_dim=1):
    """PyTorch-convention params: W (out, in), b (out,); BN gamma=1, beta=0."""
    sizes = [input_dim] + list(hidden_layers) + [output_dim]
    layers = []
    for i in range(len(sizes) - 1):
        fan_in, fan_out = sizes[i], sizes[i + 1]
        key, kw, kb = jax.random.split(key, 3)
        bound = 1.0 / (fan_in ** 0.5)
        layer = {
            "w": jax.random.uniform(kw, (fan_out, fan_in), jnp.float32, -bound, bound),
            "b": jax.random.uniform(kb, (fan_out,), jnp.float32, -bound, bound),
        }
        if i < len(sizes) - 2:
            layer["gamma"] = jnp.ones((fan_out,), jnp.float32)
            layer["beta"] = jnp.zeros((fan_out,), jnp.float32)
        layers.append(layer)
    return layers


def pack_params(layers, input_dim, output_dim=1):
    """Pack weights into one (L, C, C) slab and vectors into one (C, 3L) slab.

    Zero fill of padded rows/cols (weights, bias, gamma, beta) is load-bearing:
    it keeps padded channel rows of all activations exactly zero in the kernel.
    """
    sizes = [input_dim] + [l["w"].shape[0] for l in layers]
    c_pad = _round_up(max(max(sizes), 8), 8)
    n_linear = len(layers)
    w_packed = jnp.zeros((n_linear, c_pad, c_pad), jnp.float32)
    v_packed = jnp.zeros((c_pad, 3 * n_linear), jnp.float32)
    layer_dims = []
    in_r = input_dim                     # x keeps its true feature dim (no pad)
    for i, l in enumerate(layers):
        out_f, in_f = l["w"].shape
        out_r = _round_up(out_f, 8)
        layer_dims.append((out_r, in_r))
        w_packed = w_packed.at[i, :out_f, :in_f].set(l["w"])
        v_packed = v_packed.at[:out_f, 3 * i].set(l["b"])
        if "gamma" in l:
            v_packed = v_packed.at[:out_f, 3 * i + 1].set(l["gamma"])
            v_packed = v_packed.at[:out_f, 3 * i + 2].set(l["beta"])
        in_r = out_r
    return w_packed, v_packed, tuple(layer_dims), input_dim, output_dim


def fcn_ref(x, layers):
    """Pure-JAX reference matching the PyTorch forward (training-mode BN)."""
    h = x
    n = len(layers)
    for i, l in enumerate(layers):
        h = h @ l["w"].T + l["b"]
        if i < n - 1:
            mean = jnp.mean(h, axis=0)
            var = jnp.mean((h - mean) ** 2, axis=0)
            h = (h - mean) * jax.lax.rsqrt(var + BN_EPS) * l["gamma"] + l["beta"]
            h = jnp.maximum(h, 0.0)
    return h


if __name__ == "__main__":
    key = jax.random.PRNGKey(0)
    batch = 32        # module default batch_size
    input_dim = 32    # small synthetic MSA-Transformer embedding dim

    key, kx = jax.random.split(key)
    x = jax.random.normal(kx, (batch, input_dim), jnp.float32)

    layers = init_params(key, input_dim)
    packed = pack_params(layers, input_dim)

    out = jax.block_until_ready(fcn_forward(x, packed))
    assert out.shape == (batch, 1), out.shape

    ref = fcn_ref(x, layers)
    assert jnp.allclose(out, ref, atol=1e-3, rtol=1e-3), float(
        jnp.max(jnp.abs(out - ref)))
    print("KERNEL_OK")
</pallas_src>

<mosaic_0001>
module attributes {stable_mosaic.version = 11 : i64} {
  func.func @_fcn_kernel(%arg0: memref<1xi32, #tpu.memory_space<smem>>, %arg1: memref<128x32xf32, #tpu.memory_space<vmem>>, %arg2: memref<4x32x32xf32, #tpu.memory_space<vmem>>, %arg3: memref<32x12xf32, #tpu.memory_space<vmem>>, %arg4: memref<1x128xf32, #tpu.memory_space<vmem>>) attributes {dimension_semantics = [], scalar_prefetch = 0 : i64, scratch_operands = 0 : i64, tpu.core_type = #tpu.core_type<tc>} {
    %c0 = arith.constant 0 : index
    %0 = memref.load %arg0[%c0] : memref<1xi32, #tpu.memory_space<smem>>
    %1 = arith.sitofp %0 : i32 to f32
    %2 = vector.broadcast %1 : f32 to vector<1x1xf32>
    %cst = arith.constant 1.000000e+00 : f32
    %3 = vector.broadcast %cst : f32 to vector<1x1xf32>
    %4 = arith.divf %3, %2 : vector<1x1xf32>
    %5 = tpu.iota {dimensions = array<i32: 1>} : vector<1x128xi32>
    %6 = vector.broadcast %0 : i32 to vector<1x128xi32>
    %7 = arith.cmpi slt, %5, %6 : vector<1x128xi32>
    %8 = arith.extui %7 : vector<1x128xi1> to vector<1x128xi32>
    %9 = arith.sitofp %8 : vector<1x128xi32> to vector<1x128xf32>
    %c0_0 = arith.constant 0 : index
    %c0_1 = arith.constant 0 : index
    %c0_2 = arith.constant 0 : index
    %10 = vector.load %arg2[%c0_0, %c0_1, %c0_2] : memref<4x32x32xf32, #tpu.memory_space<vmem>>, vector<1x8x32xf32>
    %11 = vector.shape_cast %10 : vector<1x8x32xf32> to vector<8x32xf32>
    %c0_3 = arith.constant 0 : index
    %c0_4 = arith.constant 0 : index
    %12 = vector.load %arg1[%c0_3, %c0_4] : memref<128x32xf32, #tpu.memory_space<vmem>>, vector<128x32xf32>
    %cst_5 = arith.constant dense<0.000000e+00> : vector<8x128xf32>
    %13 = tpu.matmul %11, %12, %cst_5 {dimension_numbers = #tpu.dot_dimension_numbers<[1], [1], [0], [0], [0, 0, 1, 0], [], []>} : vector<8x32xf32>, vector<128x32xf32>, vector<8x128xf32> -> vector<8x128xf32>
    %c0_6 = arith.constant 0 : index
    %c1 = arith.constant 1 : index
    %14 = vector.load %arg3[%c0_6, %c1] : memref<32x12xf32, #tpu.memory_space<vmem>>, vector<8x1xf32>
    %c0_7 = arith.constant 0 : index
    %c2 = arith.constant 2 : index
    %15 = vector.load %arg3[%c0_7, %c2] : memref<32x12xf32, #tpu.memory_space<vmem>>, vector<8x1xf32>
    %cst_8 = arith.constant dense<0.000000e+00> : vector<8xf32>
    %16 = vector.multi_reduction <add>, %13, %cst_8 [1] : vector<8x128xf32> to vector<8xf32>
    %17 = vector.shape_cast %16 : vector<8xf32> to vector<8x1xf32>
    %18 = arith.mulf %13, %13 : vector<8x128xf32>
    %cst_9 = arith.constant dense<0.000000e+00> : vector<8xf32>
    %19 = vector.multi_reduction <add>, %18, %cst_9 [1] : vector<8x128xf32> to vector<8xf32>
    %20 = vector.shape_cast %19 : vector<8xf32> to vector<8x1xf32>
    %21 = vector.broadcast %4 : vector<1x1xf32> to vector<8x1xf32>
    %22 = arith.mulf %17, %21 : vector<8x1xf32>
    %23 = vector.broadcast %4 : vector<1x1xf32> to vector<8x1xf32>
    %24 = arith.mulf %20, %23 : vector<8x1xf32>
    %25 = arith.mulf %22, %22 : vector<8x1xf32>
    %26 = arith.subf %24, %25 : vector<8x1xf32>
    %cst_10 = arith.constant 9.99999974E-6 : f32
    %27 = vector.broadcast %cst_10 : f32 to vector<8x1xf32>
    %28 = arith.addf %26, %27 : vector<8x1xf32>
    %29 = math.rsqrt %28 : vector<8x1xf32>
    %30 = arith.mulf %14, %29 : vector<8x1xf32>
    %31 = arith.mulf %22, %30 : vector<8x1xf32>
    %32 = arith.subf %15, %31 : vector<8x1xf32>
    %33 = vector.broadcast %30 : vector<8x1xf32> to vector<8x128xf32>
    %34 = arith.mulf %13, %33 : vector<8x128xf32>
    %35 = vector.broadcast %32 : vector<8x1xf32> to vector<8x128xf32>
    %36 = arith.addf %34, %35 : vector<8x128xf32>
    %cst_11 = arith.constant 0.000000e+00 : f32
    %37 = vector.broadcast %cst_11 : f32 to vector<8x128xf32>
    %38 = arith.maximumf %36, %37 : vector<8x128xf32>
    %39 = vector.broadcast %9 : vector<1x128xf32> to vector<8x128xf32>
    %40 = arith.mulf %38, %39 : vector<8x128xf32>
    %c1_12 = arith.constant 1 : index
    %c0_13 = arith.constant 0 : index
    %c0_14 = arith.constant 0 : index
    %41 = vector.load %arg2[%c1_12, %c0_13, %c0_14] : memref<4x32x32xf32, #tpu.memory_space<vmem>>, vector<1x16x8xf32>
    %42 = vector.shape_cast %41 : vector<1x16x8xf32> to vector<16x8xf32>
    %cst_15 = arith.constant dense<0.000000e+00> : vector<16x128xf32>
    %43 = tpu.matmul %42, %40, %cst_15 {dimension_numbers = #tpu.dot_dimension_numbers<[1], [0], [0], [1], [0, 0, 1, 1], [], []>} : vector<16x8xf32>, vector<8x128xf32>, vector<16x128xf32> -> vector<16x128xf32>
    %c0_16 = arith.constant 0 : index
    %c4 = arith.constant 4 : index
    %44 = vector.load %arg3[%c0_16, %c4] : memref<32x12xf32, #tpu.memory_space<vmem>>, vector<16x1xf32>
    %c0_17 = arith.constant 0 : index
    %c5 = arith.constant 5 : index
    %45 = vector.load %arg3[%c0_17, %c5] : memref<32x12xf32, #tpu.memory_space<vmem>>, vector<16x1xf32>
    %cst_18 = arith.constant dense<0.000000e+00> : vector<16xf32>
    %46 = vector.multi_reduction <add>, %43, %cst_18 [1] : vector<16x128xf32> to vector<16xf32>
    %47 = vector.shape_cast %46 : vector<16xf32> to vector<16x1xf32>
    %48 = arith.mulf %43, %43 : vector<16x128xf32>
    %cst_19 = arith.constant dense<0.000000e+00> : vector<16xf32>
    %49 = vector.multi_reduction <add>, %48, %cst_19 [1] : vector<16x128xf32> to vector<16xf32>
    %50 = vector.shape_cast %49 : vector<16xf32> to vector<16x1xf32>
    %51 = vector.broadcast %4 : vector<1x1xf32> to vector<16x1xf32>
    %52 = arith.mulf %47, %51 : vector<16x1xf32>
    %53 = vector.broadcast %4 : vector<1x1xf32> to vector<16x1xf32>
    %54 = arith.mulf %50, %53 : vector<16x1xf32>
    %55 = arith.mulf %52, %52 : vector<16x1xf32>
    %56 = arith.subf %54, %55 : vector<16x1xf32>
    %cst_20 = arith.constant 9.99999974E-6 : f32
    %57 = vector.broadcast %cst_20 : f32 to vector<16x1xf32>
    %58 = arith.addf %56, %57 : vector<16x1xf32>
    %59 = math.rsqrt %58 : vector<16x1xf32>
    %60 = arith.mulf %44, %59 : vector<16x1xf32>
    %61 = arith.mulf %52, %60 : vector<16x1xf32>
    %62 = arith.subf %45, %61 : vector<16x1xf32>
    %63 = vector.broadcast %60 : vector<16x1xf32> to vector<16x128xf32>
    %64 = arith.mulf %43, %63 : vector<16x128xf32>
    %65 = vector.broadcast %62 : vector<16x1xf32> to vector<16x128xf32>
    %66 = arith.addf %64, %65 : vector<16x128xf32>
    %cst_21 = arith.constant 0.000000e+00 : f32
    %67 = vector.broadcast %cst_21 : f32 to vector<16x128xf32>
    %68 = arith.maximumf %66, %67 : vector<16x128xf32>
    %69 = vector.broadcast %9 : vector<1x128xf32> to vector<16x128xf32>
    %70 = arith.mulf %68, %69 : vector<16x128xf32>
    %c2_22 = arith.constant 2 : index
    %c0_23 = arith.constant 0 : index
    %c0_24 = arith.constant 0 : index
    %71 = vector.load %arg2[%c2_22, %c0_23, %c0_24] : memref<4x32x32xf32, #tpu.memory_space<vmem>>, vector<1x8x16xf32>
    %72 = vector.shape_cast %71 : vector<1x8x16xf32> to vector<8x16xf32>
    %cst_25 = arith.constant dense<0.000000e+00> : vector<8x128xf32>
    %73 = tpu.matmul %72, %70, %cst_25 {dimension_numbers = #tpu.dot_dimension_numbers<[1], [0], [0], [1], [0, 0, 1, 1], [], []>} : vector<8x16xf32>, vector<16x128xf32>, vector<8x128xf32> -> vector<8x128xf32>
    %c0_26 = arith.constant 0 : index
    %c7 = arith.constant 7 : index
    %74 = vector.load %arg3[%c0_26, %c7] : memref<32x12xf32, #tpu.memory_space<vmem>>, vector<8x1xf32>
    %c0_27 = arith.constant 0 : index
    %c8 = arith.constant 8 : index
    %75 = vector.load %arg3[%c0_27, %c8] : memref<32x12xf32, #tpu.memory_space<vmem>>, vector<8x1xf32>
    %cst_28 = arith.constant dense<0.000000e+00> : vector<8xf32>
    %76 = vector.multi_reduction <add>, %73, %cst_28 [1] : vector<8x128xf32> to vector<8xf32>
    %77 = vector.shape_cast %76 : vector<8xf32> to vector<8x1xf32>
    %78 = arith.mulf %73, %73 : vector<8x128xf32>
    %cst_29 = arith.constant dense<0.000000e+00> : vector<8xf32>
    %79 = vector.multi_reduction <add>, %78, %cst_29 [1] : vector<8x128xf32> to vector<8xf32>
    %80 = vector.shape_cast %79 : vector<8xf32> to vector<8x1xf32>
    %81 = vector.broadcast %4 : vector<1x1xf32> to vector<8x1xf32>
    %82 = arith.mulf %77, %81 : vector<8x1xf32>
    %83 = vector.broadcast %4 : vector<1x1xf32> to vector<8x1xf32>
    %84 = arith.mulf %80, %83 : vector<8x1xf32>
    %85 = arith.mulf %82, %82 : vector<8x1xf32>
    %86 = arith.subf %84, %85 : vector<8x1xf32>
    %cst_30 = arith.constant 9.99999974E-6 : f32
    %87 = vector.broadcast %cst_30 : f32 to vector<8x1xf32>
    %88 = arith.addf %86, %87 : vector<8x1xf32>
    %89 = math.rsqrt %88 : vector<8x1xf32>
    %90 = arith.mulf %74, %89 : vector<8x1xf32>
    %91 = arith.mulf %82, %90 : vector<8x1xf32>
    %92 = arith.subf %75, %91 : vector<8x1xf32>
    %93 = vector.broadcast %90 : vector<8x1xf32> to vector<8x128xf32>
    %94 = arith.mulf %73, %93 : vector<8x128xf32>
    %95 = vector.broadcast %92 : vector<8x1xf32> to vector<8x128xf32>
    %96 = arith.addf %94, %95 : vector<8x128xf32>
    %cst_31 = arith.constant 0.000000e+00 : f32
    %97 = vector.broadcast %cst_31 : f32 to vector<8x128xf32>
    %98 = arith.maximumf %96, %97 : vector<8x128xf32>
    %c3 = arith.constant 3 : index
    %c0_32 = arith.constant 0 : index
    %c0_33 = arith.constant 0 : index
    %99 = vector.load %arg2[%c3, %c0_32, %c0_33] : memref<4x32x32xf32, #tpu.memory_space<vmem>>, vector<1x8x8xf32>
    %100 = vector.shape_cast %99 : vector<1x8x8xf32> to vector<8x8xf32>
    %cst_34 = arith.constant dense<0.000000e+00> : vector<8x128xf32>
    %101 = tpu.matmul %100, %98, %cst_34 {dimension_numbers = #tpu.dot_dimension_numbers<[1], [0], [0], [1], [0, 0, 1, 1], [], []>} : vector<8x8xf32>, vector<8x128xf32>, vector<8x128xf32> -> vector<8x128xf32>
    %c0_35 = arith.constant 0 : index
    %c9 = arith.constant 9 : index
    %102 = vector.load %arg3[%c0_35, %c9] : memref<32x12xf32, #tpu.memory_space<vmem>>, vector<8x1xf32>
    %103 = vector.broadcast %102 : vector<8x1xf32> to vector<8x128xf32>
    %104 = arith.addf %101, %103 : vector<8x128xf32>
    %105 = vector.extract_strided_slice %104 {offsets = [0, 0], sizes = [1, 128], strides = [1, 1]} : vector<8x128xf32> to vector<1x128xf32>
    %c0_36 = arith.constant 0 : index
    %c0_37 = arith.constant 0 : index
    %106 = vector.load %arg4[%c0_36, %c0_37] : memref<1x128xf32, #tpu.memory_space<vmem>>, vector<1x128xf32>
    tpu.vector_store %arg4[%c0_36, %c0_37], %105 {strides = array<i32>} : memref<1x128xf32, #tpu.memory_space<vmem>>, vector<1x128xf32>,
    return
  }
}

</mosaic_0001>

<bundles_post_ra>
// kernel: tpu_custom_call.1
= control target key start
LH: loop header
LB: loop body
LE: loop exit
PB: predicated region body
PF: predicated region fallthrough
CT: control target
= control target key end

     0   :  { %vm47_vm0 = vcmask 261120   ;;  %v748_v2 = vmov 0.0|0.0   ;;  %vm749_vm2 = vmmov 0   ;;  %v750_v5 = vmov 0.0   ;;  %s943_s0 = inlined_call_operand.<no memory space> [shape: s32[1], index: 0, kind: input, shape index: {}]   ;;  %s944_s1 = inlined_call_operand.vmem [shape: f32[128,32], index: 1, kind: input, shape index: {}]   ;;  %s945_s2 = inlined_call_operand.vmem [shape: f32[4,32,32], index: 2, kind: input, shape index: {}]   ;;  %s946_s3 = inlined_call_operand.vmem [shape: f32[32,12], index: 3, kind: input, shape index: {}]   ;;  %s947_s4 = inlined_call_operand.hbm [shape: f32[1,128], index: 4, kind: output, shape index: {}]  }
   0x1   :  { %v31_v0 = vld [vmem:[%s944_s1] sm:$0xff]  ;;  %v32_v1 = vld [vmem:[%s944_s1 + $0x8] sm:$0xff]  ;;  %658 = vmatprep.subr.bf16.mxu0 %v748_v2  ;;  %vm794_vm1 = vmpackc.low %vm47_vm0, %vm47_vm0  ;;  %638 = vmatprep.mubr.msk.f32.mxu0 %vm749_vm2, %v750_v5 }
   0x2   :  { %v659_v3 = vpack.c.bf16 %v32_v1, %v31_v0  ;;  %v33_v6 = vld [vmem:[%s944_s1 + $0x10] sm:$0xff]  ;;  %v34_v7 = vld [vmem:[%s944_s1 + $0x18] sm:$0xff] }
   0x4   :  { %661 = vmatpush3.bf16.xpose.msk.msra.mxu0 %vm794_vm1, %v659_v3 }
   0x5   :  { %662 = vmatprep.subr.bf16.mxu0 %v748_v2 }
   0x6   :  { %10 = vsyncpa [#allocation4], 0  ;;  %v663_v8 = vpack.c.bf16 %v34_v7, %v33_v6  ;;  %v35_v9 = vld [vmem:[%s944_s1 + $0x20] sm:$0xff]  ;;  %v36_v10 = vld [vmem:[%s944_s1 + $0x28] sm:$0xff]  ;;  %v751_v31 = vmov 1   ;;  %v752_v41 = vmov 2   ;;  %v24_v49 = vlaneseq }
   0x7   :  { %v667_v11 = vpack.c.bf16 %v36_v10, %v35_v9  ;;  %v37_v12 = vld [vmem:[%s944_s1 + $0x30] sm:$0xff]  ;;  %v38_v13 = vld [vmem:[%s944_s1 + $0x38] sm:$0xff]  ;;  %v39_v15 = vld [vmem:[%s944_s1 + $0x40] sm:$0xff]  ;;  %705 = vset.pattern.permute.xlu1 %v751_v31  ;;  %706 = vset.pattern.permute.xlu0 %v752_v41  ;;  %s753_s27 = smov 1   ;;  %vm205_vm3 = vcmask 64512   ;;  %v26_v52 = vstv %s943_s0  ;;  %v754_v0 = vmov 4  }
   0x8   :  { %v671_v14 = vpack.c.bf16 %v38_v13, %v37_v12  ;;  %v40_v16 = vld [vmem:[%s944_s1 + $0x48] sm:$0xff]  ;;  %v41_v18 = vld [vmem:[%s944_s1 + $0x50] sm:$0xff]  ;;  %v42_v19 = vld [vmem:[%s944_s1 + $0x58] sm:$0xff]  ;;  %v25_v50 = vand.u32 127, %v24_v49  ;;  %vm355_vm5 = vcmask 130048   ;;  %s759_s12 = smov [#allocation3]  }
   0x9   :  { %v675_v17 = vpack.c.bf16 %v40_v16, %v39_v15  ;;  %v679_v20 = vpack.c.bf16 %v42_v19, %v41_v18  ;;  %v43_v21 = vld [vmem:[%s944_s1 + $0x60] sm:$0xff]  ;;  %v44_v22 = vld [vmem:[%s944_s1 + $0x68] sm:$0xff]  ;;  %v45_v24 = vld [vmem:[%s944_s1 + $0x70] sm:$0xff]  ;;  %v755_v16 = vmov 5   ;;  %s547_s13 = sshll.u32 %s759_s12, 4  ;;  %s548_s13 = int_to_ptr.vmem [resolvable:$true] %s547_s13 }
   0xa   :  { %v683_v23 = vpack.c.bf16 %v44_v22, %v43_v21  ;;  %v46_v25 = vld [vmem:[%s944_s1 + $0x78] sm:$0xff]  ;;  %v30_v27 = vld [vmem:[%s945_s2] sm:$0xff]  ;;  %s20_s1 = scvt.s32.f32 %s943_s0  ;;  %vm27_vm4 = vcmp.lt.s32.totalorder %v25_v50, %v26_v52  ;;  %v574_v59 = vld [vmem:[%s945_s2 + $0x28] sm:$0xff]  ;;  %s724_s14 = scalar_lea.vmem %s548_s13, 16 }
   0xb   :  { %v687_v26 = vpack.c.bf16 %v46_v25, %v45_v24  ;;  %v879_v42 = vld [vmem:[%s946_s3] sm:$0xff]  ;;  %v892_v56 = vsel %vm27_vm4, 1.0, %v750_v5  ;;  %v288_v19 = vld [vmem:[%s946_s3 + $0x8] sm:$0xff]  ;;  %p725_p0 = scmp.ne.s32.totalorder %s548_s13, %s724_s14  ;;  %s728_s15 = scalar_lea.vmem %s548_s13, 32 }
   0xc   :  { %665 = vmatpush3.bf16.xpose.msk.msra.mxu0 %vm794_vm1, %v663_v8  ;;  %v21_v32 = vstv %s20_s1  ;;  %v573_v48 = vld [vmem:[%s945_s2 + $0x20] sm:$0xff]  ;;  %p729_p1 = scmp.lt.s32.totalorder %s548_s13, %s548_s13  ;;  %p730_p2 = scmp.lt.s32.totalorder %s728_s15, %s724_s14 }
   0xd   :  { %666 = vmatprep.subr.bf16.mxu0 %v748_v2  ;;  %714 = vrcp.f32 %v21_v32  ;;  %643 = vmatprep.mubr.msk.f32.mxu1 %vm205_vm3, %v573_v48 }
   0xe   :  { %p731_p3 = por %p730_p2, %p729_p1 }
  0x10   :  { %p732_p4 = pnand %p731_p3, %p725_p0 }
  0x14   :  { %669 = vmatpush3.bf16.xpose.msk.msra.mxu0 %vm794_vm1, %v667_v11 }
  0x15   :  { %670 = vmatprep.subr.bf16.mxu0 %v748_v2 }
  0x17   :  { %v872_v33 = vpop.eup %714 }
  0x1c   :  { %673 = vmatpush3.bf16.xpose.msk.msra.mxu0 %vm794_vm1, %v671_v14 }
  0x1d   :  { %674 = vmatprep.subr.bf16.mxu0 %v748_v2 }
  0x24   :  { %677 = vmatpush3.bf16.xpose.msk.msra.mxu0 %vm794_vm1, %v675_v17 }
  0x25   :  { %678 = vmatprep.subr.bf16.mxu0 %v748_v2 }
  0x2c   :  { %681 = vmatpush3.bf16.xpose.msk.msra.mxu0 %vm794_vm1, %v679_v20 }
  0x2d   :  { %682 = vmatprep.subr.bf16.mxu0 %v748_v2 }
  0x34   :  { %685 = vmatpush3.bf16.xpose.msk.msra.mxu0 %vm794_vm1, %v683_v23 }
  0x35   :  { %686 = vmatprep.subr.bf16.mxu0 %v748_v2 }
  0x3c   :  { %689 = vmatpush3.bf16.xpose.msk.msra.mxu0 %vm794_vm1, %v687_v26 }
  0x43   :  { %639 = vmatmul.mubr.msk.f32.vlgmr.msra.gmra.mrb[0].mxu0 %vm47_vm0, %v30_v27 }
 0x116   :  { %v165_v28 = vpop.f32.mrb[0].mxu0 }
 0x117   :  { %170 = vadd.xlane.f32.xlu0 %v165_v28  ;;  %v640_v29 = vpop.f32.mrb[1].mxu0  ;;  %v172_v30 = vmul.f32 %v165_v28, %v165_v28 }
 0x11b   :  { %173 = vadd.xlane.f32.xlu0 %v172_v30 }
 0x1a4   :  { %v171_v34 = vpop.xlane.xlu0 %170 }
 0x1a5   :  { %v175_v35 = vmul.f32 %v872_v33, %v171_v34 }
 0x1a7   :  { %v177_v37 = vmul.f32 %v175_v35, %v175_v35 }
 0x1a8   :  { %v174_v36 = vpop.xlane.xlu0 %173 }
 0x1a9   :  { %v176_v38 = vmul.f32 %v872_v33, %v174_v36 }
 0x1ab   :  { %v178_v39 = vsub.f32 %v176_v38, %v177_v37 }
 0x1ad   :  { %v179_v40 = vadd.f32 1e-05, %v178_v39 }
 0x1af   :  { %716 = vrsqrt.f32 %v179_v40 }
 0x1b9   :  { %v717_v43 = vpop.eup %716 }
 0x1ba   :  { %v181_v44 = vmul.f32 %v717_v43, %v879_v42  ;;  %v577_v43 = vld [vmem:[%s945_s2 + $0x40] sm:$0xff] }
 0x1bc   :  { %v182_v45 = vmul.f32 %v181_v44, %v175_v35 }
 0x1be   :  { %184 = vrot.lane.b32.xlu1 %v182_v45, %s753_s27 }
 0x1c2   :  { %190 = vperm.xlu1 %705, %v181_v44  }
 0x1c6   :  { %707 = vset.pattern.permute.xlu1 %v754_v0 }
 0x230   :  { %v185_v46 = vpop.permute.xlu1 %184 }
 0x231   :  { %v187_v47 = vsub.f32 %v879_v42, %v185_v46 }
 0x233   :  { %196 = vperm.xlu0 %706, %v187_v47   ;;  %v756_v47 = vmov 7  }
 0x237   :  { %709 = vset.pattern.permute.xlu0 %v755_v16 }
 0x241   :  { %v191_v51 = vpop.permute.xlu1 %190 }
 0x242   :  { %v193_v53 = vmul.f32 %v191_v51, %v165_v28 }
 0x2b2   :  { %v197_v54 = vpop.permute.xlu0 %196 }
 0x2b3   :  { %v199_v55 = vadd.f32 %v197_v54, %v193_v53 }
 0x2b5   :  { %v200_v57 = vmax.f32 %v199_v55, 0.0 }
 0x2b7   :  { %v201_v58 = vmul.f32 %v892_v56, %v200_v57  ;;  %v757_v57 = vmov 8  }
 0x2b9   :  { %641 = vmatprep.subr.mxu1 %v201_v58 }
 0x2ba   :  { %642 = vmatpush3.msra.mxu1 %v201_v58 }
 0x2bb   :  { %644 = vmatmul.mubr.msk.f32.vlgmr.msra.gmra.mrb[0].mxu1 %vm205_vm3, %v574_v59  ;;  %690 = vmatprep.subr.bf16.mxu1 %v748_v2 }
 0x2bc   :  { %650 = vmatprep.mubr.msk.f32.mxu1 %vm749_vm2, %v750_v5 }
 0x38e   :  { %v645_v60 = vpop.f32.mrb[0].mxu1 }
 0x38f   :  { %291 = vadd.xlane.f32.xlu1 %v645_v60  ;;  %v278_v61 = vpop.f32.mrb[1].mxu1  ;;  %v294_v62 = vmul.f32 %v645_v60, %v645_v60 }
 0x390   :  { %v293_v63 = vmul.f32 %v278_v61, %v278_v61 }
 0x391   :  { %297 = vadd.xlane.f32.xlu0 %v294_v62 }
 0x393   :  { %289 = vadd.xlane.f32.xlu1 %v278_v61 }
 0x397   :  { %295 = vadd.xlane.f32.xlu1 %v293_v63 }
 0x41c   :  { %v292_v1 = vpop.xlane.xlu1 %291 }
 0x41d   :  { %v300_v3 = vmul.f32 %v872_v33, %v292_v1  ;;  %v579_v1 = vld [vmem:[%s945_s2 + $0x60] sm:$0xff] }
 0x41e   :  { %v298_v4 = vpop.xlane.xlu0 %297 }
 0x41f   :  { %v304_v6 = vmul.f32 %v300_v3, %v300_v3  ;;  %v302_v2 = vmul.f32 %v872_v33, %v298_v4 }
 0x420   :  { %v290_v7 = vpop.xlane.xlu1 %289 }
 0x421   :  { %v299_v8 = vmul.f32 %v872_v33, %v290_v7  ;;  %v306_v9 = vsub.f32 %v302_v2, %v304_v6 }
 0x423   :  { %v303_v11 = vmul.f32 %v299_v8, %v299_v8  ;;  %v308_v13 = vadd.f32 1e-05, %v306_v9 }
 0x424   :  { %v296_v10 = vpop.xlane.xlu1 %295 }
 0x425   :  { %v301_v12 = vmul.f32 %v872_v33, %v296_v10  ;;  %718 = vrsqrt.f32 %v308_v13 }
 0x427   :  { %v305_v14 = vsub.f32 %v301_v12, %v303_v11 }
 0x429   :  { %v307_v15 = vadd.f32 1e-05, %v305_v14 }
 0x42b   :  { %720 = vrsqrt.f32 %v307_v15 }
 0x42f   :  { %v719_v17 = vpop.eup %718 }
 0x430   :  { %v312_v22 = vmul.f32 %v719_v17, %v288_v19 }
 0x432   :  { %v314_v23 = vmul.f32 %v312_v22, %v300_v3 }
 0x435   :  { %v721_v18 = vpop.eup %720 }
 0x436   :  { %v311_v20 = vmul.f32 %v721_v18, %v879_v42 }
 0x438   :  { %v313_v21 = vmul.f32 %v311_v20, %v299_v8 }
 0x43a   :  { %317 = vrot.lane.b32.xlu1 %v313_v21, %s753_s27 }
 0x43e   :  { %319 = vrot.lane.b32.xlu1 %v314_v23, %s753_s27 }
 0x442   :  { %327 = vperm.xlu1 %707, %v311_v20  }
 0x446   :  { %332 = vperm.xlu1 %707, %v312_v22  }
 0x44a   :  { %708 = vset.pattern.permute.xlu1 %v755_v16 }
 0x4ac   :  { %v318_v24 = vpop.permute.xlu1 %317 }
 0x4ad   :  { %v323_v25 = vsub.f32 %v879_v42, %v318_v24 }
 0x4af   :  { %339 = vperm.xlu1 %708, %v323_v25  }
 0x4b0   :  { %v320_v26 = vpop.permute.xlu1 %319 }
 0x4b1   :  { %v324_v27 = vsub.f32 %v288_v19, %v320_v26 }
 0x4b3   :  { %344 = vperm.xlu0 %709, %v324_v27  }
 0x4b7   :  { %710 = vset.pattern.permute.xlu0 %v756_v47 }
 0x4c1   :  { %v328_v28 = vpop.permute.xlu1 %327 }
 0x4c2   :  { %v335_v30 = vmul.f32 %v328_v28, %v278_v61 }
 0x4c5   :  { %v333_v29 = vpop.permute.xlu1 %332 }
 0x4c6   :  { %v336_v34 = vmul.f32 %v645_v60, %v333_v29  ;;  %v758_v60 = vmov 9  }
 0x4c7   :  { %712 = vset.pattern.permute.xlu1 %v758_v60 }
 0x52e   :  { %v340_v31 = vpop.permute.xlu1 %339 }
 0x52f   :  { %v347_v32 = vadd.f32 %v340_v31, %v335_v30 }
 0x531   :  { %v349_v36 = vmax.f32 %v347_v32, 0.0 }
 0x532   :  { %v345_v35 = vpop.permute.xlu0 %344 }
 0x533   :  { %v348_v37 = vadd.f32 %v345_v35, %v336_v34  ;;  %v351_v39 = vmul.f32 %v892_v56, %v349_v36 }
 0x535   :  { %v350_v38 = vmax.f32 %v348_v37, 0.0 }
 0x537   :  { %v352_v40 = vmul.f32 %v892_v56, %v350_v38 }
 0x539   :  { %v691_v41 = vpack.c.bf16 %v352_v40, %v351_v39 }
 0x53b   :  { %692 = vmatpush3.bf16.msra.mxu1 %v691_v41 }
 0x53c   :  { %653 = vmatprep.subr.mxu1 %v750_v5 }
 0x53e   :  { %651 = vmatmul.mubr.msk.f32.vlgmr.msra.gmra.mrb[2].mxu1 %vm355_vm5, %v577_v43 }
 0x53f   :  { %655 = vmatprep.mubr.msk.f32.mxu1 %vm749_vm2, %v750_v5 }
 0x611   :  { %v425_v44 = vpop.f32.mrb[2].mxu1 }
 0x612   :  { %429 = vadd.xlane.f32.xlu1 %v425_v44  ;;  %v652_v45 = vpop.f32.mrb[3].mxu1  ;;  %v431_v46 = vmul.f32 %v425_v44, %v425_v44 }
 0x616   :  { %432 = vadd.xlane.f32.xlu1 %v431_v46 }
 0x69f   :  { %v430_v48 = vpop.xlane.xlu1 %429 }
 0x6a0   :  { %v434_v49 = vmul.f32 %v872_v33, %v430_v48 }
 0x6a2   :  { %v436_v51 = vmul.f32 %v434_v49, %v434_v49 }
 0x6a3   :  { %v433_v50 = vpop.xlane.xlu1 %432 }
 0x6a4   :  { %v435_v52 = vmul.f32 %v872_v33, %v433_v50 }
 0x6a6   :  { %v437_v53 = vsub.f32 %v435_v52, %v436_v51 }
 0x6a8   :  { %v438_v54 = vadd.f32 1e-05, %v437_v53 }
 0x6aa   :  { %722 = vrsqrt.f32 %v438_v54 }
 0x6b4   :  { %v723_v55 = vpop.eup %722 }
 0x6b5   :  { %v440_v5 = vmul.f32 %v723_v55, %v879_v42 }
 0x6b7   :  { %449 = vperm.xlu0 %710, %v440_v5   ;;  %v441_v56 = vmul.f32 %v440_v5, %v434_v49 }
 0x6b9   :  { %443 = vrot.lane.b32.xlu1 %v441_v56, %s753_s27 }
 0x6bb   :  { %711 = vset.pattern.permute.xlu0 %v757_v57 }
 0x6bd   :  { %464 = vperm.xlu1 %712, %v879_v42  }
 0x72b   :  { %v444_v58 = vpop.permute.xlu1 %443 }
 0x72c   :  { %v446_v59 = vsub.f32 %v879_v42, %v444_v58 }
 0x72e   :  { %455 = vperm.xlu0 %711, %v446_v59  }
 0x732   :  { %713 = vset.pattern.permute.xlu0 %v758_v60 }
 0x736   :  { %v450_v33 = vpop.permute.xlu0 %449 }
 0x737   :  { %v452_v61 = vmul.f32 %v450_v33, %v425_v44 }
 0x73c   :  { %v465_v3 = vpop.permute.xlu1 %464 }
 0x7ad   :  { %v456_v62 = vpop.permute.xlu0 %455 }
 0x7ae   :  { %v458_v63 = vadd.f32 %v456_v62, %v452_v61 }
 0x7b0   :  { %v459_v0 = vmax.f32 %v458_v63, 0.0 }
 0x7b2   :  { %654 = vmatpush3.msra.mxu1 %v459_v0 }
 0x7b3   :  { %656 = vmatmul.mubr.msk.f32.vlgmr.msra.gmra.mrb[4].mxu1 %vm205_vm3, %v579_v1 }
 0x886   :  { %v536_v4 = vpop.f32.mrb[4].mxu1 }
 0x887   :  { %v537_v6 = vadd.f32 %v536_v4, %v465_v3  ;;  %v657_v2 = vpop.f32.mrb[5].mxu1 }
 0x889   :  { %540 = vst [vmem:[#allocation3] sm:$0x1] %v537_v6 }
 0x88a   :  { %735 = shalt.err (!%p732_p4)
}
 0x88b   :  { %s736_s17 = scalar_lea.hbm %s947_s4, 16 }
 0x88c   :  { %p737_p5 = scmp.ne.s32.totalorder %s947_s4, %s736_s17  ;;  %p740_p6 = scmp.lt.u32.totalorder %s736_s17, %s947_s4 }
 0x88e   :  { %p742_p7 = pnand %p740_p6, %p737_p5 }
 0x890   :  { %745 = shalt.err (!%p742_p7)
}
 0x891   :  { %550 = dma.vmem_to_hbm [thread:$0]  %s548_s13, 16, %s947_s4, [#allocation4]  }
 0x892   :  { %746 = dma.done.wait [#allocation4], 16  }
 0x893   :  { %747 = vsyncadd [#allocation4], 4294967280 }
 0x894   :  { %554 = vsyncpa [#allocation4], 1 }

</bundles_post_ra>
